<compile_context>
chip_gen: v6e
topology: v6e:2x2x1
jax: 0.10.0
libtpu: 0.0.40
codegen_flags: <defaults>
</compile_context>

<pallas_src>
import jax
import jax.numpy as jnp
from jax.experimental import pallas as pl
from jax.experimental.pallas import tpu as pltpu


def _round_up(x, m):
    return (x + m - 1) // m * m


# ----------------------------------------------------------------------------
# Kernel
# ----------------------------------------------------------------------------
def _attention_gate_kernel(g_ref, x_ref, wg_ref, wx_ref, ba_ref, wpsi_ref,
                           bpsi_ref, out_ref):
    """Lane-dense attention gate for one (batch, spatial-tile) grid step.

    g_ref    : (F_g,  TM)   gating-signal tile (channels on sublanes)
    x_ref    : (F_l,  TM)   skip-connection tile
    wg_ref   : (F_int, F_g) BN-folded W_g, transposed for  W @ G
    wx_ref   : (F_int, F_l) BN-folded W_x
    ba_ref   : (F_int, 1)   combined BN-folded bias  b_g + b_x
    wpsi_ref : (F_int, 1)   BN-folded psi weights (column vector)
    bpsi_ref : (1, 1)       BN-folded psi bias, in SMEM
    out_ref  : (F_l,  TM)
    """
    x = x_ref[...]
    # Two small-K MXU matmuls; results are lane-dense (F_int, TM).
    a = (jnp.dot(wg_ref[...], g_ref[...], preferred_element_type=jnp.float32)
         + jnp.dot(wx_ref[...], x, preferred_element_type=jnp.float32)
         + ba_ref[...])
    a = jnp.maximum(a, 0.0)                                   # ReLU
    # psi branch: weighted sum over the F_int sublanes (VPU mul + XLU reduce)
    # instead of an N=1 MXU matmul with a 1-lane result.
    psi = jnp.sum(a * wpsi_ref[...], axis=0, keepdims=True) + bpsi_ref[0, 0]
    psi = jax.nn.sigmoid(psi)                                 # (1, TM)
    out_ref[...] = (x * psi).astype(out_ref.dtype)


# ----------------------------------------------------------------------------
# Tile selection
# ----------------------------------------------------------------------------
def _pick_tile(S, tm_target, tm_cap):
    """Pick TM (multiple of 128) and the padded spatial size S_pad.

    Prefers a TM that exactly divides round_up(S, 128) so the wrapper never
    has to jnp.pad (which costs a full HBM read+write of g and x). Falls back
    to tile-aligned padding only when the best divisor tile would be tiny.
    """
    S128 = _round_up(S, 128)
    n_lanes = S128 // 128
    tm_limit = max(128, min(tm_target, tm_cap) // 128 * 128)
    limit = tm_limit // 128

    # largest divisor of n_lanes that is <= limit
    best = 1
    d = 1
    while d * d <= n_lanes:
        if n_lanes % d == 0:
            if d <= limit:
                best = max(best, d)
            q = n_lanes // d
            if q <= limit:
                best = max(best, q)
        d += 1
    tm = best * 128
    S_pad = S128

    # Fallback: divisor tile too small to reach HBM roofline -> pad instead.
    if tm < 512 and tm_limit >= 512 and S128 > tm_limit:
        tm = tm_limit
        S_pad = _round_up(S128, tm)
    return tm, S_pad


# ----------------------------------------------------------------------------
# pallas_call wrapper
# ----------------------------------------------------------------------------
def attention_gate_pallas(g3, x3, wg_t, wx_t, ba, wpsi, bpsi, *,
                          tm_target=2048,
                          vmem_budget_bytes=40 * 1024 * 1024):
    """g3: (N, F_g, S), x3: (N, F_l, S) in channel-major (NCDHW-flattened) form.

    Returns (N, F_l, S) = x * psi.
    """
    N, F_g, S = g3.shape
    _, F_l, _ = x3.shape
    F_int = wg_t.shape[0]

    # ---- lane-tile selection (multiple of 128, capped by a VMEM budget that
    #      is conservative enough for v7x's 64 MiB core) ----------------------
    bytes_per_lane = 4 * (F_g + 2 * F_l) * 2          # g + x + out, double-buffered
    tm_cap = max(128, (vmem_budget_bytes // bytes_per_lane) // 128 * 128)
    tm, S_pad = _pick_tile(S, tm_target, tm_cap)

    # ---- pad the spatial axis only if the chosen tile requires it -----------
    if S_pad != S:
        pad = ((0, 0), (0, 0), (0, S_pad - S))
        g3 = jnp.pad(g3, pad)
        x3 = jnp.pad(x3, pad)

    grid = (N, S_pad // tm)

    # ---- scoped-VMEM limit: only raise it when we actually need more than
    #      the default; never exceed what a v7x core can hold -----------------
    tile_bytes = 4 * tm * (F_g + 2 * F_l)
    needed = 2 * tile_bytes + 4 * F_int * (F_g + F_l + 2)
    vmem_limit = None
    if needed > 24 * 1024 * 1024:
        vmem_limit = int(min(56 * 1024 * 1024, needed + 8 * 1024 * 1024))

    # ---- advisory cost estimate ---------------------------------------------
    P = N * S
    cost = pl.CostEstimate(
        flops=int(2 * P * F_int * (F_g + F_l) + 3 * P * F_int + 2 * P * F_l),
        transcendentals=int(P),
        bytes_accessed=int(4 * P * (F_g + 2 * F_l)
                           + 4 * F_int * (F_g + F_l + 2) + 4),
    )

    full = lambda n, i: (0, 0)   # un-tiled (resident) parameters

    out = pl.pallas_call(
        _attention_gate_kernel,
        out_shape=jax.ShapeDtypeStruct((N, F_l, S_pad), x3.dtype),
        grid_spec=pltpu.PrefetchScalarGridSpec(
            num_scalar_prefetch=0,
            grid=grid,
            in_specs=[
                pl.BlockSpec((None, F_g, tm), lambda n, i: (n, 0, i)),  # g tile
                pl.BlockSpec((None, F_l, tm), lambda n, i: (n, 0, i)),  # x tile
                pl.BlockSpec((F_int, F_g), full),                       # W_g^T
                pl.BlockSpec((F_int, F_l), full),                       # W_x^T
                pl.BlockSpec((F_int, 1), full),                         # b_g + b_x
                pl.BlockSpec((F_int, 1), full),                         # w_psi
                pl.BlockSpec(memory_space=pltpu.MemorySpace.SMEM),      # b_psi
            ],
            out_specs=pl.BlockSpec((None, F_l, tm), lambda n, i: (n, 0, i)),
        ),
        compiler_params=pltpu.CompilerParams(
            dimension_semantics=("parallel", "parallel"),
            vmem_limit_bytes=vmem_limit),
        cost_estimate=cost,
    )(g3, x3, wg_t, wx_t, ba, wpsi, bpsi)

    if S_pad != S:
        out = out[:, :, :S]
    return out


# ----------------------------------------------------------------------------
# BN folding + module-level forward (NCDHW, like the PyTorch module)
# ----------------------------------------------------------------------------
def _fold_bn(w, b, gamma, beta, mean, var, eps=1e-5):
    """Fold eval-mode BatchNorm into a 1x1x1 conv.

    w: (C_in, C_out) matmul-layout weight, b: (C_out,) conv bias.
    Returns folded (w', b') with  y = x @ w' + b'   (exact for eval-mode BN).
    """
    scale = gamma / jnp.sqrt(var + eps)          # (C_out,)
    return w * scale[None, :], (b - mean) * scale + beta


def attention_block_forward(g, x, params, *, tm_target=2048):
    """g: (N, F_g, D, H, W), x: (N, F_l, D, H, W) — PyTorch NCDHW layout."""
    N, F_g, D, H, W = g.shape
    _, F_l, _, _, _ = x.shape
    S = D * H * W

    wg, bg = _fold_bn(params["wg"], params["bg_conv"], params["g_gamma"],
                      params["g_beta"], params["g_mean"], params["g_var"])
    wx, bx = _fold_bn(params["wx"], params["bx_conv"], params["x_gamma"],
                      params["x_beta"], params["x_mean"], params["x_var"])
    wpsi, bpsi = _fold_bn(params["wpsi"], params["bpsi_conv"],
                          params["p_gamma"], params["p_beta"],
                          params["p_mean"], params["p_var"])
    F_int = wg.shape[1]

    # Kernel-layout parameters: weights transposed to (C_out, C_in); the two
    # branch biases summed (exact, since relu(g1 + x1) adds them anyway).
    wg_t = jnp.transpose(wg)                      # (F_int, F_g)
    wx_t = jnp.transpose(wx)                      # (F_int, F_l)
    ba = (bg + bx).reshape(F_int, 1)              # (F_int, 1)
    wpsi_c = wpsi.reshape(F_int, 1)               # (F_int, 1)
    bpsi_s = bpsi.reshape(1, 1)                   # (1, 1) scalar -> SMEM

    # No NCDHW -> NDHWC transposes: reshape only, batch becomes a grid axis.
    g3 = g.reshape(N, F_g, S)
    x3 = x.reshape(N, F_l, S)

    out3 = attention_gate_pallas(g3, x3, wg_t, wx_t, ba, wpsi_c, bpsi_s,
                                 tm_target=tm_target)
    return out3.reshape(N, F_l, D, H, W)


# ----------------------------------------------------------------------------
# Pure-JAX reference (matches the PyTorch module, eval-mode BN)
# ----------------------------------------------------------------------------
def _reference_forward(g, x, params, eps=1e-5):
    def conv_bn(inp, w, b, gamma, beta, mean, var):
        y = jnp.einsum('ncdhw,ck->nkdhw', inp, w) + b[None, :, None, None, None]
        scale = gamma / jnp.sqrt(var + eps)
        return (y - mean[None, :, None, None, None]) * \
            scale[None, :, None, None, None] + beta[None, :, None, None, None]

    g1 = conv_bn(g, params["wg"], params["bg_conv"], params["g_gamma"],
                 params["g_beta"], params["g_mean"], params["g_var"])
    x1 = conv_bn(x, params["wx"], params["bx_conv"], params["x_gamma"],
                 params["x_beta"], params["x_mean"], params["x_var"])
    a = jnp.maximum(g1 + x1, 0.0)
    psi = conv_bn(a, params["wpsi"], params["bpsi_conv"], params["p_gamma"],
                  params["p_beta"], params["p_mean"], params["p_var"])
    psi = jax.nn.sigmoid(psi)
    return x * psi


def make_params(key, F_g, F_l, F_int):
    ks = jax.random.split(key, 6)
    return {
        # conv weights stored in matmul layout (C_in, C_out)
        "wg": jax.random.normal(ks[0], (F_g, F_int), jnp.float32) * 0.2,
        "bg_conv": jax.random.normal(ks[1], (F_int,), jnp.float32) * 0.1,
        "wx": jax.random.normal(ks[2], (F_l, F_int), jnp.float32) * 0.2,
        "bx_conv": jax.random.normal(ks[3], (F_int,), jnp.float32) * 0.1,
        "wpsi": jax.random.normal(ks[4], (F_int, 1), jnp.float32) * 0.2,
        "bpsi_conv": jax.random.normal(ks[5], (1,), jnp.float32) * 0.1,
        # BatchNorm (eval-mode) params — deterministic, non-trivial
        "g_gamma": jnp.linspace(0.8, 1.2, F_int, dtype=jnp.float32),
        "g_beta": jnp.linspace(-0.1, 0.1, F_int, dtype=jnp.float32),
        "g_mean": jnp.linspace(-0.05, 0.05, F_int, dtype=jnp.float32),
        "g_var": jnp.linspace(0.9, 1.1, F_int, dtype=jnp.float32),
        "x_gamma": jnp.linspace(1.1, 0.9, F_int, dtype=jnp.float32),
        "x_beta": jnp.linspace(0.05, -0.05, F_int, dtype=jnp.float32),
        "x_mean": jnp.linspace(0.02, -0.02, F_int, dtype=jnp.float32),
        "x_var": jnp.linspace(1.05, 0.95, F_int, dtype=jnp.float32),
        "p_gamma": jnp.array([1.05], jnp.float32),
        "p_beta": jnp.array([0.02], jnp.float32),
        "p_mean": jnp.array([0.01], jnp.float32),
        "p_var": jnp.array([0.98], jnp.float32),
    }


if __name__ == "__main__":
    key = jax.random.PRNGKey(0)
    kg, kx, kp, kg2, kx2 = jax.random.split(key, 5)

    # Main case: F_g = F_l = 4, F_int = 8, batch = 2, 3-D spatial = 16^3
    # -> S = 4096 per batch item (tile = 2048, grid = (2, 2)).
    N, F_g, F_l, F_int = 2, 4, 4, 8
    D = H = W = 16
    g = jax.random.normal(kg, (N, F_g, D, H, W), jnp.float32)
    x = jax.random.normal(kx, (N, F_l, D, H, W), jnp.float32)
    params = make_params(kp, F_g, F_l, F_int)

    out = jax.block_until_ready(attention_block_forward(g, x, params))
    ref = _reference_forward(g, x, params)
    assert out.shape == (N, F_l, D, H, W)
    assert jnp.allclose(out, ref, atol=1e-5, rtol=1e-5), \
        f"mismatch: max abs err {jnp.max(jnp.abs(out - ref))}"

    # Ragged case: spatial = 5^3 -> S = 125 (not a multiple of 128) exercises
    # the lane-padded tail path.
    D2 = H2 = W2 = 5
    g2 = jax.random.normal(kg2, (N, F_g, D2, H2, W2), jnp.float32)
    x2 = jax.random.normal(kx2, (N, F_l, D2, H2, W2), jnp.float32)
    out2 = jax.block_until_ready(attention_block_forward(g2, x2, params))
    ref2 = _reference_forward(g2, x2, params)
    assert out2.shape == (N, F_l, D2, H2, W2)
    assert jnp.allclose(out2, ref2, atol=1e-5, rtol=1e-5), \
        f"mismatch (ragged): max abs err {jnp.max(jnp.abs(out2 - ref2))}"

    print("KERNEL_OK")
</pallas_src>

<mosaic_0001>
module attributes {stable_mosaic.version = 11 : i64} {
  func.func @_attention_gate_kernel(%arg0: i32, %arg1: i32, %arg2: memref<1x4x2048xf32, #tpu.memory_space<vmem>>, %arg3: memref<1x4x2048xf32, #tpu.memory_space<vmem>>, %arg4: memref<8x4xf32, #tpu.memory_space<vmem>>, %arg5: memref<8x4xf32, #tpu.memory_space<vmem>>, %arg6: memref<8x1xf32, #tpu.memory_space<vmem>>, %arg7: memref<8x1xf32, #tpu.memory_space<vmem>>, %arg8: memref<1x1xf32, #tpu.memory_space<smem>>, %arg9: memref<1x4x2048xf32, #tpu.memory_space<vmem>>) attributes {dimension_semantics = [#tpu.dimension_semantics<parallel>, #tpu.dimension_semantics<parallel>], iteration_bounds = array<i64: 2, 2>, scalar_prefetch = 0 : i64, scratch_operands = 0 : i64, tpu.core_type = #tpu.core_type<tc>, window_params = [{transform_indices = @transform_0, window_bounds = array<i64: 1, 4, 2048>}, {transform_indices = @transform_1, window_bounds = array<i64: 1, 4, 2048>}, {pipeline_mode = #tpu.pipeline_mode<synchronous>, transform_indices = @transform_2, window_bounds = array<i64: 8, 4>}, {pipeline_mode = #tpu.pipeline_mode<synchronous>, transform_indices = @transform_3, window_bounds = array<i64: 8, 4>}, {pipeline_mode = #tpu.pipeline_mode<synchronous>, transform_indices = @transform_4, window_bounds = array<i64: 8, 1>}, {pipeline_mode = #tpu.pipeline_mode<synchronous>, transform_indices = @transform_5, window_bounds = array<i64: 8, 1>}, {transform_indices = @transform_6, window_bounds = array<i64: 1, 1>}, {transform_indices = @transform_7, window_bounds = array<i64: 1, 4, 2048>}]} {
    %c0 = arith.constant 0 : index
    %c0_0 = arith.constant 0 : index
    %c0_1 = arith.constant 0 : index
    %0 = vector.load %arg3[%c0, %c0_0, %c0_1] : memref<1x4x2048xf32, #tpu.memory_space<vmem>>, vector<1x4x2048xf32>
    %1 = vector.shape_cast %0 : vector<1x4x2048xf32> to vector<4x2048xf32>
    %c0_2 = arith.constant 0 : index
    %c0_3 = arith.constant 0 : index
    %2 = vector.load %arg4[%c0_2, %c0_3] : memref<8x4xf32, #tpu.memory_space<vmem>>, vector<8x4xf32>
    %c0_4 = arith.constant 0 : index
    %c0_5 = arith.constant 0 : index
    %c0_6 = arith.constant 0 : index
    %3 = vector.load %arg2[%c0_4, %c0_5, %c0_6] : memref<1x4x2048xf32, #tpu.memory_space<vmem>>, vector<1x4x2048xf32>
    %4 = vector.shape_cast %3 : vector<1x4x2048xf32> to vector<4x2048xf32>
    %cst = arith.constant dense<0.000000e+00> : vector<8x2048xf32>
    %5 = tpu.matmul %2, %4, %cst {dimension_numbers = #tpu.dot_dimension_numbers<[1], [0], [0], [1], [0, 0, 1, 1], [], []>} : vector<8x4xf32>, vector<4x2048xf32>, vector<8x2048xf32> -> vector<8x2048xf32>
    %c0_7 = arith.constant 0 : index
    %c0_8 = arith.constant 0 : index
    %6 = vector.load %arg5[%c0_7, %c0_8] : memref<8x4xf32, #tpu.memory_space<vmem>>, vector<8x4xf32>
    %cst_9 = arith.constant dense<0.000000e+00> : vector<8x2048xf32>
    %7 = tpu.matmul %6, %1, %cst_9 {dimension_numbers = #tpu.dot_dimension_numbers<[1], [0], [0], [1], [0, 0, 1, 1], [], []>} : vector<8x4xf32>, vector<4x2048xf32>, vector<8x2048xf32> -> vector<8x2048xf32>
    %8 = arith.addf %5, %7 : vector<8x2048xf32>
    %c0_10 = arith.constant 0 : index
    %c0_11 = arith.constant 0 : index
    %9 = vector.load %arg6[%c0_10, %c0_11] : memref<8x1xf32, #tpu.memory_space<vmem>>, vector<8x1xf32>
    %10 = vector.broadcast %9 : vector<8x1xf32> to vector<8x2048xf32>
    %11 = arith.addf %8, %10 : vector<8x2048xf32>
    %cst_12 = arith.constant 0.000000e+00 : f32
    %12 = vector.broadcast %cst_12 : f32 to vector<8x2048xf32>
    %13 = arith.maximumf %11, %12 : vector<8x2048xf32>
    %c0_13 = arith.constant 0 : index
    %c0_14 = arith.constant 0 : index
    %14 = vector.load %arg7[%c0_13, %c0_14] : memref<8x1xf32, #tpu.memory_space<vmem>>, vector<8x1xf32>
    %15 = vector.broadcast %14 : vector<8x1xf32> to vector<8x2048xf32>
    %16 = arith.mulf %13, %15 : vector<8x2048xf32>
    %cst_15 = arith.constant dense<0.000000e+00> : vector<2048xf32>
    %17 = vector.multi_reduction <add>, %16, %cst_15 [0] : vector<8x2048xf32> to vector<2048xf32>
    %18 = vector.shape_cast %17 : vector<2048xf32> to vector<1x2048xf32>
    %c0_16 = arith.constant 0 : index
    %c0_17 = arith.constant 0 : index
    %19 = memref.load %arg8[%c0_16, %c0_17] : memref<1x1xf32, #tpu.memory_space<smem>>
    %20 = vector.broadcast %19 : f32 to vector<1x2048xf32>
    %21 = arith.addf %18, %20 : vector<1x2048xf32>
    %22 = arith.negf %21 : vector<1x2048xf32>
    %23 = math.exp %22 : vector<1x2048xf32>
    %cst_18 = arith.constant 1.000000e+00 : f32
    %24 = vector.broadcast %cst_18 : f32 to vector<1x2048xf32>
    %25 = arith.addf %24, %23 : vector<1x2048xf32>
    %26 = arith.divf %24, %25 : vector<1x2048xf32>
    %27 = vector.broadcast %26 : vector<1x2048xf32> to vector<4x2048xf32>
    %28 = arith.mulf %1, %27 : vector<4x2048xf32>
    %c0_19 = arith.constant 0 : index
    %c0_20 = arith.constant 0 : index
    %c0_21 = arith.constant 0 : index
    %29 = vector.load %arg9[%c0_19, %c0_20, %c0_21] : memref<1x4x2048xf32, #tpu.memory_space<vmem>>, vector<1x4x2048xf32>
    %30 = vector.shape_cast %29 : vector<1x4x2048xf32> to vector<4x2048xf32>
    %31 = vector.shape_cast %28 : vector<4x2048xf32> to vector<1x4x2048xf32>
    tpu.vector_store %arg9[%c0_19, %c0_20, %c0_21], %31 {strides = array<i32>} : memref<1x4x2048xf32, #tpu.memory_space<vmem>>, vector<1x4x2048xf32>,
    return
  }
  func.func @transform_0(%arg0: i32, %arg1: i32) -> (i32, i32, i32) {
    %c0_i32 = arith.constant 0 : i32
    %c0_i32_0 = arith.constant 0 : i32
    return %arg0, %c0_i32, %arg1 : i32, i32, i32
  }
  func.func @transform_1(%arg0: i32, %arg1: i32) -> (i32, i32, i32) {
    %c0_i32 = arith.constant 0 : i32
    %c0_i32_0 = arith.constant 0 : i32
    return %arg0, %c0_i32, %arg1 : i32, i32, i32
  }
  func.func @transform_2(%arg0: i32, %arg1: i32) -> (i32, i32) {
    %c0_i32 = arith.constant 0 : i32
    %c0_i32_0 = arith.constant 0 : i32
    %c0_i32_1 = arith.constant 0 : i32
    return %c0_i32, %c0_i32_0 : i32, i32
  }
  func.func @transform_3(%arg0: i32, %arg1: i32) -> (i32, i32) {
    %c0_i32 = arith.constant 0 : i32
    %c0_i32_0 = arith.constant 0 : i32
    %c0_i32_1 = arith.constant 0 : i32
    return %c0_i32, %c0_i32_0 : i32, i32
  }
  func.func @transform_4(%arg0: i32, %arg1: i32) -> (i32, i32) {
    %c0_i32 = arith.constant 0 : i32
    %c0_i32_0 = arith.constant 0 : i32
    %c0_i32_1 = arith.constant 0 : i32
    return %c0_i32, %c0_i32_0 : i32, i32
  }
  func.func @transform_5(%arg0: i32, %arg1: i32) -> (i32, i32) {
    %c0_i32 = arith.constant 0 : i32
    %c0_i32_0 = arith.constant 0 : i32
    %c0_i32_1 = arith.constant 0 : i32
    return %c0_i32, %c0_i32_0 : i32, i32
  }
  func.func @transform_6(%arg0: i32, %arg1: i32) -> (i32, i32) {
    %c0_i32 = arith.constant 0 : i32
    %c0_i32_0 = arith.constant 0 : i32
    %c0_i32_1 = arith.constant 0 : i32
    return %c0_i32, %c0_i32_0 : i32, i32
  }
  func.func @transform_7(%arg0: i32, %arg1: i32) -> (i32, i32, i32) {
    %c0_i32 = arith.constant 0 : i32
    %c0_i32_0 = arith.constant 0 : i32
    return %arg0, %c0_i32, %arg1 : i32, i32, i32
  }
}

</mosaic_0001>

<bundles_post_ra>
// kernel: tpu_custom_call.1
= control target key start
LH: loop header
LB: loop body
LE: loop exit
PB: predicated region body
PF: predicated region fallthrough
CT: control target
= control target key end

     0   :  { %s2964_s0 = inlined_call_operand.hbm [shape: f32[2,4,4096], index: 0, kind: input, shape index: {}]   ;;  %s2965_s1 = inlined_call_operand.hbm [shape: f32[2,4,4096], index: 1, kind: input, shape index: {}]   ;;  %s2966_s2 = inlined_call_operand.vmem [shape: f32[8,4], index: 2, kind: input, shape index: {}]   ;;  %s2967_s3 = inlined_call_operand.vmem [shape: f32[8,4], index: 3, kind: input, shape index: {}]   ;;  %s2968_s4 = inlined_call_operand.vmem [shape: f32[8,1], index: 4, kind: input, shape index: {}]   ;;  %s2969_s5 = inlined_call_operand.vmem [shape: f32[8,1], index: 5, kind: input, shape index: {}]   ;;  %s2970_s6 = inlined_call_operand.<no memory space> [shape: f32[1,1], index: 6, kind: input, shape index: {}]   ;;  %s2971_s7 = inlined_call_operand.hbm [shape: f32[2,4,4096], index: 7, kind: output, shape index: {}]  }
   0x1   :  { %2976 = sst [smem:[#allocation16_spill]] %s2964_s0 }
   0x2   :  { %12 = sst [smem:[#allocation2]] %s2970_s6 }
   0x3   :  { %13 = vsyncpa [#allocation4], 0 }
   0x4   :  { %15 = vsyncpa [#allocation4 + $0x1], 0 }
   0x5   :  { %16 = vsyncpa [#allocation7], 0 }
   0x6   :  { %18 = vsyncpa [#allocation7 + $0x1], 0 }
   0x7   :  { %19 = vsyncpa [#allocation5], 0 }
   0x8   :  { %21 = vsyncpa [#allocation5 + $0x1], 0  ;;  %s2523_s26 = smov 0   ;;  %s2525_s27 = smov 0  }
   0x9   :  { %s2527_s28 = smov 0   ;;  %s2529_s29 = smov 0  }
   0xa   :  { %s2531_s30 = smov 0   ;;  %s2533_s8 = smov 0  }
   0xb   :  { %s2535_s9 = smov 0   ;;  %s2537_s6 = smov 0  }
   0xc LB: > { %2977 = sst [smem:[#allocation12_spill]] %s2469_s9  ;;  %s2065_s10 = sadd.s32 4294967295, %s2473_s6   ;;  %s2473_s6 = sphi %s2537_s6, %s27_s6   ;;  %s2469_s9 = sphi %s2535_s9, %s2991_s9   ;;  %s2465_s8 = sphi %s2533_s8, %s2996_s8   ;;  %s2461_s30 = sphi %s2531_s30, %s2989_s30   ;;  %s2457_s29 = sphi %s2529_s29, %s2995_s29   ;;  %s2453_s28 = sphi %s2527_s28, %s2994_s28   ;;  %s2449_s27 = sphi %s2525_s27, %s2993_s27   ;;  %s2445_s26 = sphi %s2523_s26, %s2992_s26  }
   0xd   : > { %s2066_s11 = sadd.s32 4294967294, %s2473_s6   ;;  %s36_s12 = sadd.s32 1, %s2465_s8 }
   0xe   : > { %s39_s13 = sadd.s32 1, %s2469_s9  ;;  %p37_p0 = scmp.ge.s32.totalorder %s36_s12, 2 }
   0xf   : > { %s48_s14 = sadd.s32 1, %s2453_s28  ;;  %p55_p1 = scmp.ne.s32.totalorder %s2453_s28, %s2449_s27 }
  0x10   : > { %p56_p2 = scmp.eq.s32.totalorder %s2473_s6, 0  ;;  %s2998_s12 = smov (%p37_p0, %s36_s12), 0 }
  0x11   : > { %2978 = sst [smem:[#allocation13_spill]] %s2998_s12  ;;  %s3000_s13 = smov (!%p37_p0, %s39_s13), %s2469_s9 }
  0x12   : > { %s44_s15 = ssub.s32 %s2465_s8, %s2998_s12  ;;  %p2576_p3 = por %p56_p2, %p55_p1 }
  0x13   : > { %p41_p4 = scmp.ge.s32.totalorder %s3000_s13, 2  ;;  %p61_p5 = scmp.ne.s32.totalorder %s2449_s27, %s2445_s26 }
  0x14   : > { %p62_p6 = scmp.eq.s32.totalorder %s2065_s10, 0  ;;  %p220_p7 = scmp.eq.s32.totalorder %s2065_s10, 3 }
  0x15   : > { %s3002_s13 = smov (%p41_p4, %s3000_s13), 0  ;;  %p226_p10 = scmp.eq.s32.totalorder %s2066_s11, 3 }
  0x16   : > { %2980 = sst [smem:[#allocation14_spill]] %s3002_s13  ;;  %p2584_p8 = por %p62_p6, %p61_p5 }
  0x17   : > { %p2588_p9 = por %p220_p7, %p55_p1  ;;  %s43_s19 = ssub.s32 %s2469_s9, %s3002_s13 }
  0x18   : > { %s45_s20 = sor.u32 %s44_s15, %s43_s19  ;;  %p2594_p12 = por %p226_p10, %p61_p5 }
  0x19   : > { %p46_p11 = scmp.eq.s32.totalorder %s45_s20, 0  ;;  %p2168_p13 = scmp.lt.s32.totalorder %s2473_s6, 4 }
  0x1a   : > { %s2983_s21 = scalar_select %p2594_p12, 1, 0 }
  0x1b   : > { %s2600_s22 = sand.u32 1, %s2453_s28   ;;  %s2070_s25 = sshll.u32 %s2465_s8, 4 }
  0x1c   : > { %2984 = sst [smem:[#allocation15_spill]] %s2983_s21  ;;  %s2069_s24 = sshll.u32 %s2600_s22, 6 }
  0x1d   : > { %s2603_s23 = scalar_select %p46_p11, %s2453_s28, %s48_s14  }
  0x1e   : > { %s2071_s10 = sshll.u32 %s2469_s9, 5  ;;  %s265_s11 = scalar_lea.vmem [#allocation3], %s2069_s24 }
  0x1f   : > { %s275_s15 = sshll.u32 %s265_s11, 4  ;;  %s271_s19 = sadd.s32 %s2071_s10, %s2070_s25  ;;  %s276_s15 = int_to_ptr.vmem [resolvable:$true] %s275_s15 }
  0x20   : > { %s2072_s20 = sshll.u32 %s271_s19, 6  ;;  %p2612_p0 = pnand %p2168_p13, %p2576_p3 }
  0x21   : > { %s2986_s0 = sld [smem:[#allocation16_spill]]  ;;  %p2077_p1 = scmp.ge.s32.totalorder %s2473_s6, 1 }
  0x22   : > { %p301_p2 = scmp.lt.s32.totalorder %s2473_s6, 5  ;;  %s262_s9 = scalar_lea.sflag [#allocation4], %s2600_s22 }
  0x23   : > { %p2319_p4 = pneg %p2612_p0  ;;  %s2330_s11 = scalar_lea.vmem %s276_s15, 1024 }
  0x24   : > { %p2331_p5 = scmp.ne.s32.totalorder %s276_s15, %s2330_s11  ;;  %s2475_s16 = smov [#allocation3]  }
  0x25   : > { %s2335_s25 = sshll.u32 %s2475_s16, 4  ;;  %s2336_s25 = int_to_ptr.vmem [resolvable:$false] %s2335_s25 }
  0x26   : > { %p2333_p6 = pnand %p2331_p5, %p2319_p4  ;;  %s2337_s10 = scalar_lea.vmem %s2336_s25, 2048 }
  0x27   : > { %s273_s14 = scalar_lea.hbm %s2986_s0, %s2072_s20  ;;  %p2338_p7 = scmp.lt.s32.totalorder %s276_s15, %s2336_s25 }
  0x28   : > { %p2334_p3 = pneg %p2333_p6  ;;  %p2339_p10 = scmp.lt.s32.totalorder %s2337_s10, %s2330_s11 }
  0x2a   : > { %p2340_p11 = por %p2339_p10, %p2338_p7 }
  0x2c   : > { %p2341_p13 = pnand %p2340_p11, %p2334_p3 }
  0x2e   : > { %2344 = shalt.err (!%p2341_p13)
}
  0x2f   : > { %2160 = dma.hbm_to_vmem [thread:$0]  (!%p2612_p0), %s273_s14, 1024, %s276_s15, %s262_s9  }
  0x30   : > { %p2633_p5 = pnand %p2077_p1, %p301_p2  ;;  %s294_s11 = scalar_lea.hbm %s2965_s1, %s2072_s20 }
  0x31   : > { %s286_s16 = scalar_lea.vmem [#allocation6], %s2069_s24  ;;  %s283_s10 = scalar_lea.sflag [#allocation7], %s2600_s22 }
  0x32   : > { %s296_s25 = sshll.u32 %s286_s16, 4  ;;  %s2476_s9 = smov [#allocation6]   ;;  %s297_s25 = int_to_ptr.vmem [resolvable:$true] %s296_s25 }
  0x33   : > { %s2358_s0 = scalar_lea.vmem %s297_s25, 1024  ;;  %s2363_s15 = sshll.u32 %s2476_s9, 4  ;;  %s2364_s15 = int_to_ptr.vmem [resolvable:$false] %s2363_s15 }
  0x34   : > { %p2359_p6 = scmp.ne.s32.totalorder %s297_s25, %s2358_s0  ;;  %s2365_s14 = scalar_lea.vmem %s2364_s15, 2048 }
  0x35   : > { %p2366_p1 = scmp.lt.s32.totalorder %s297_s25, %s2364_s15  ;;  %p2367_p2 = scmp.lt.s32.totalorder %s2365_s14, %s2358_s0 }
  0x36   : > { %p2361_p3 = pnand %p2359_p6, %p2319_p4 }
  0x37   : > { %p2368_p10 = por %p2367_p2, %p2366_p1 }
  0x38   : > { %p2362_p7 = pneg %p2361_p3 }
  0x3a   : > { %p2369_p11 = pnand %p2368_p10, %p2362_p7 }
  0x3c   : > { %2372 = shalt.err (!%p2369_p11)
}
  0x3d   : > { %2163 = dma.hbm_to_vmem [thread:$0]  (!%p2612_p0), %s294_s11, 1024, %s297_s25, %s283_s10  }
  0x3e   : > { %305 = sbr.rel (%p2633_p5) target bundleno = 395 (0x18b), region = 48  ;;  %s2651_s22 = sand.u32 (!%p2633_p5), 1, %s2449_s27  }
  0x3f   : > { %s2654_s24 = sshll.u32 (!%p2633_p5), %s2651_s22, 6  ;;  %s308_s20 = scalar_lea.sflag (!%p2633_p5), [#allocation4], %s2651_s22 }
  0x40   : > { %s2658_s0 = scalar_lea.vmem (!%p2633_p5), [#allocation3], %s2654_s24 }
  0x43   : > { %2432 = dma.done.wait (%p2584_p8), %s308_s20, 1024  }
  0x44   : > { %2434 = vsyncadd (%p2584_p8), %s308_s20, 4294966272  ;;  %s317_s13 = scalar_lea.sflag [#allocation7], %s2651_s22  ;;  %s2666_s12 = scalar_lea.vmem [#allocation6], %s2654_s24 }
  0x45   : > { %2436 = dma.done.wait (%p2584_p8), %s317_s13, 1024  }
  0x46   : > { %2438 = vsyncadd (%p2584_p8), %s317_s13, 4294966272  ;;  %v2477_v0 = vmov 0.0   ;;  %v2478_v1 = vmov 0   ;;  %v2675_v2 = vld [vmem:[%s2666_s12] sm:$0xff]  ;;  %vm397_vm0 = vcmask 1043456   ;;  %v2678_v3 = vld [vmem:[%s2666_s12 + $0x8] sm:$0xff] }
  0x47   : > { %494 = vmatprep.mubr.f32.mxu0 %v2477_v0  ;;  %565 = vmatprep.mubr.f32.mxu1 %v2477_v0  ;;  %v385_v4 = vcombine.high %v2675_v2, %v2675_v2  ;;  %v386_v5 = vcombine.high %v2678_v3, %v2678_v3  ;;  %v2685_v6 = vld [vmem:[%s2666_s12 + $0x10] sm:$0xff]  ;;  %v2688_v7 = vld [vmem:[%s2666_s12 + $0x18] sm:$0xff]  ;;  %v376_v8 = vld [vmem:[%s2967_s3] sm:$0xff]  ;;  %vm393_vm1 = vcmask 31744   ;;  %s1773_s15 = sld [smem:[#allocation2]]  ;;  %s2901_s14 = scalar_lea.vmem [#allocation8], %s2654_s24 }
  0x48   : > { %2236 = vset.pattern.permute.xlu0 %v2478_v1  ;;  %v387_v9 = vcombine.high %v2685_v6, %v2685_v6  ;;  %v388_v10 = vcombine.high %v2688_v7, %v2688_v7  ;;  %v2700_v11 = vld [vmem:[%s2666_s12 + $0x20] sm:$0xff]  ;;  %v2703_v12 = vld [vmem:[%s2666_s12 + $0x28] sm:$0xff]  ;;  %v2722_v15 = vld [vmem:[%s2666_s12 + $0x30] sm:$0xff]  ;;  %s2146_s24 = sshll.u32 %s2457_s29, 4  ;;  %s2147_s20 = sshll.u32 %s2461_s30, 5 }
  0x49   : > { %2081 = vmatprep.subr.msk.mxu0 %vm397_vm0, %v385_v4  ;;  %2084 = vmatprep.subr.msk.mxu1 %vm397_vm0, %v386_v5  ;;  %v389_v13 = vcombine.high %v2700_v11, %v2700_v11  ;;  %v390_v14 = vcombine.high %v2703_v12, %v2703_v12  ;;  %v2725_v16 = vld [vmem:[%s2666_s12 + $0x38] sm:$0xff]  ;;  %v391_v17 = vcombine.high %v2722_v15, %v2722_v15  ;;  %v368_v19 = vld [vmem:[%s2658_s0] sm:$0xff]  ;;  %v369_v20 = vld [vmem:[%s2658_s0 + $0x8] sm:$0xff]  ;;  %s1952_s30 = sshll.u32 %s2901_s14, 4  ;;  %s1936_s21 = scalar_lea.sflag [#allocation5], %s2651_s22  ;;  %s1953_s30 = int_to_ptr.vmem [resolvable:$true] %s1952_s30 }
  0x4a   : > { %2082 = vmatpush1.msk.msra.mxu0 %vm397_vm0, %v2675_v2  ;;  %2085 = vmatpush1.msk.msra.mxu1 %vm397_vm0, %v2678_v3  ;;  %v392_v18 = vcombine.high %v2725_v16, %v2725_v16  ;;  %v1006_v21 = vcombine.high %v368_v19, %v368_v19  ;;  %v1007_v22 = vcombine.high %v369_v20, %v369_v20  ;;  %v370_v23 = vld [vmem:[%s2658_s0 + $0x10] sm:$0xff]  ;;  %v371_v24 = vld [vmem:[%s2658_s0 + $0x18] sm:$0xff]  ;;  %v367_v25 = vld [vmem:[%s2966_s2] sm:$0xff]  ;;  %s2373_s19 = scalar_lea.vmem %s1953_s30, 1024  ;;  %s2479_s11 = smov [#allocation8]  }
  0x4b   : > { %2083 = vmatmul.mubr.msk.f32.vlgmr.msra.gmra.mxu0 %vm393_vm1, %v376_v8  ;;  %2086 = vmatmul.mubr.msk.f32.vlgmr.msra.gmra.mxu1 %vm393_vm1, %v376_v8  ;;  %v1008_v26 = vcombine.high %v370_v23, %v370_v23  ;;  %v1009_v27 = vcombine.high %v371_v24, %v371_v24  ;;  %v372_v28 = vld [vmem:[%s2658_s0 + $0x20] sm:$0xff]  ;;  %v373_v29 = vld [vmem:[%s2658_s0 + $0x28] sm:$0xff]  ;;  %v374_v32 = vld [vmem:[%s2658_s0 + $0x30] sm:$0xff]  ;;  %p2374_p8 = scmp.ne.s32.totalorder %s1953_s30, %s2373_s19  ;;  %s2377_s16 = sshll.u32 %s2479_s11, 4  ;;  %s2378_s16 = int_to_ptr.vmem [resolvable:$false] %s2377_s16 }
  0x4c   : > { %2087 = vmatprep.subr.msk.mxu0 %vm397_vm0, %v387_v9  ;;  %2090 = vmatprep.subr.msk.mxu1 %vm397_vm0, %v388_v10  ;;  %v1010_v30 = vcombine.high %v372_v28, %v372_v28  ;;  %v1011_v31 = vcombine.high %v373_v29, %v373_v29  ;;  %v375_v33 = vld [vmem:[%s2658_s0 + $0x38] sm:$0xff]  ;;  %v1012_v34 = vcombine.high %v374_v32, %v374_v32  ;;  %v1617_v36 = vld [vmem:[%s2968_s4] sm:$0xff]  ;;  %s1948_s0 = sadd.s32 %s2147_s20, %s2146_s24  ;;  %s2379_s25 = scalar_lea.vmem %s2378_s16, 2048 }
  0x4d   : > { %2088 = vmatpush1.msk.msra.mxu0 %vm397_vm0, %v2685_v6  ;;  %2091 = vmatpush1.msk.msra.mxu1 %vm397_vm0, %v2688_v7  ;;  %v1013_v35 = vcombine.high %v375_v33, %v375_v33  ;;  %v1655_v37 = vld [vmem:[%s2969_s5] sm:$0xff]  ;;  %s2148_s29 = sshll.u32 %s1948_s0, 6  ;;  %p2375_p0 = pnand %p2374_p8, %p2588_p9 }
  0x4e   : > { %636 = vmatprep.mubr.f32.mxu0 %v2477_v0  ;;  %707 = vmatprep.mubr.f32.mxu1 %v2477_v0  ;;  %s1950_s17 = scalar_lea.hbm %s2971_s7, %s2148_s29  ;;  %p2380_p13 = scmp.lt.s32.totalorder %s1953_s30, %s2378_s16 }
  0x4f   : > { %2089 = vmatmul.mubr.msk.f32.vlgmr.msra.gmra.mxu0 %vm393_vm1, %v376_v8  ;;  %2092 = vmatmul.mubr.msk.f32.vlgmr.msra.gmra.mxu1 %vm393_vm1, %v376_v8  ;;  %p2376_p4 = pneg %p2375_p0  ;;  %p2381_p5 = scmp.lt.s32.totalorder %s2379_s25, %s2373_s19 }
  0x50   : > { %2093 = vmatprep.subr.msk.mxu0 %vm397_vm0, %v389_v13  ;;  %2096 = vmatprep.subr.msk.mxu1 %vm397_vm0, %v390_v14 }
  0x51   : > { %2094 = vmatpush1.msk.msra.mxu0 %vm397_vm0, %v2700_v11  ;;  %2097 = vmatpush1.msk.msra.mxu1 %vm397_vm0, %v2703_v12  ;;  %p2382_p6 = por %p2381_p5, %p2380_p13 }
  0x52   : > { %778 = vmatprep.mubr.f32.mxu0 %v2477_v0  ;;  %849 = vmatprep.mubr.f32.mxu1 %v2477_v0 }
  0x53   : > { %2095 = vmatmul.mubr.msk.f32.vlgmr.msra.gmra.mxu0 %vm393_vm1, %v376_v8  ;;  %2098 = vmatmul.mubr.msk.f32.vlgmr.msra.gmra.mxu1 %vm393_vm1, %v376_v8  ;;  %p2383_p3 = pnand %p2382_p6, %p2376_p4 }
  0x54   : > { %2099 = vmatprep.subr.msk.mxu0 %vm397_vm0, %v391_v17  ;;  %2102 = vmatprep.subr.msk.mxu1 %vm397_vm0, %v392_v18 }
  0x55   : > { %2100 = vmatpush1.msk.msra.mxu0 %vm397_vm0, %v2722_v15  ;;  %2103 = vmatpush1.msk.msra.mxu1 %vm397_vm0, %v2725_v16 }
  0x56   : > { %920 = vmatprep.mubr.f32.mxu0 %v2477_v0  ;;  %991 = vmatprep.mubr.f32.mxu1 %v2477_v0 }
  0x57   : > { %2101 = vmatmul.mubr.msk.f32.vlgmr.msra.gmra.mxu0 %vm393_vm1, %v376_v8  ;;  %2104 = vmatmul.mubr.msk.f32.vlgmr.msra.gmra.mxu1 %vm393_vm1, %v376_v8 }
  0x58   : > { %2105 = vmatprep.subr.msk.mxu0 %vm397_vm0, %v1006_v21  ;;  %2108 = vmatprep.subr.msk.mxu1 %vm397_vm0, %v1007_v22 }
  0x59   : > { %2106 = vmatpush1.msk.msra.mxu0 %vm397_vm0, %v368_v19  ;;  %2109 = vmatpush1.msk.msra.mxu1 %vm397_vm0, %v369_v20  ;;  %v2828_v19 = vstv %s1773_s15 }
  0x5a   : > { %1113 = vmatprep.mubr.f32.mxu0 %v2477_v0  ;;  %1184 = vmatprep.mubr.f32.mxu1 %v2477_v0 }
  0x5b   : > { %2107 = vmatmul.mubr.msk.f32.vlgmr.msra.gmra.mxu0 %vm393_vm1, %v367_v25  ;;  %2110 = vmatmul.mubr.msk.f32.vlgmr.msra.gmra.mxu1 %vm393_vm1, %v367_v25 }
  0x5c   : > { %2111 = vmatprep.subr.msk.mxu0 %vm397_vm0, %v1008_v26  ;;  %2114 = vmatprep.subr.msk.mxu1 %vm397_vm0, %v1009_v27 }
  0x5d   : > { %2112 = vmatpush1.msk.msra.mxu0 %vm397_vm0, %v370_v23  ;;  %2115 = vmatpush1.msk.msra.mxu1 %vm397_vm0, %v371_v24 }
  0x5e   : > { %1255 = vmatprep.mubr.f32.mxu0 %v2477_v0  ;;  %1326 = vmatprep.mubr.f32.mxu1 %v2477_v0 }
  0x5f   : > { %2113 = vmatmul.mubr.msk.f32.vlgmr.msra.gmra.mxu0 %vm393_vm1, %v367_v25  ;;  %2116 = vmatmul.mubr.msk.f32.vlgmr.msra.gmra.mxu1 %vm393_vm1, %v367_v25 }
  0x60   : > { %2117 = vmatprep.subr.msk.mxu0 %vm397_vm0, %v1010_v30  ;;  %2120 = vmatprep.subr.msk.mxu1 %vm397_vm0, %v1011_v31 }
  0x61   : > { %2118 = vmatpush1.msk.msra.mxu0 %vm397_vm0, %v372_v28  ;;  %2121 = vmatpush1.msk.msra.mxu1 %vm397_vm0, %v373_v29 }
  0x62   : > { %1397 = vmatprep.mubr.f32.mxu0 %v2477_v0  ;;  %1468 = vmatprep.mubr.f32.mxu1 %v2477_v0 }
  0x63   : > { %2119 = vmatmul.mubr.msk.f32.vlgmr.msra.gmra.mxu0 %vm393_vm1, %v367_v25  ;;  %2122 = vmatmul.mubr.msk.f32.vlgmr.msra.gmra.mxu1 %vm393_vm1, %v367_v25 }
  0x64   : > { %2123 = vmatprep.subr.msk.mxu0 %vm397_vm0, %v1012_v34  ;;  %2126 = vmatprep.subr.msk.mxu1 %vm397_vm0, %v1013_v35 }
  0x65   : > { %2124 = vmatpush1.msk.msra.mxu0 %vm397_vm0, %v374_v32  ;;  %2127 = vmatpush1.msk.msra.mxu1 %vm397_vm0, %v375_v33 }
  0x66   : > { %1539 = vmatprep.mubr.f32.mxu0 %v2477_v0  ;;  %1610 = vmatprep.mubr.f32.mxu1 %v2477_v0 }
  0x67   : > { %2125 = vmatmul.mubr.msk.f32.vlgmr.msra.gmra.mxu0 %vm393_vm1, %v367_v25  ;;  %2128 = vmatmul.mubr.msk.f32.vlgmr.msra.gmra.mxu1 %vm393_vm1, %v367_v25 }
  0x68   : > { %1620 = vperm.xlu0 %2236, %v1617_v36  }
  0x6c   : > { %1658 = vperm.xlu0 %2236, %v1655_v37  }
  0xe3   : > { %v2820_v54 = vpop.permute.xlu0 %1620 }
  0xe7   : > { %v2826_v13 = vpop.permute.xlu0 %1658 }
 0x10b   : > { %v496_v38 = vpop.f32.mrf.mxu0  ;;  %v567_v39 = vpop.f32.mrf.mxu1 }
 0x10d   : > { %v498_v40 = vpop.f32.mrf.mxu0  ;;  %v569_v41 = vpop.f32.mrf.mxu1 }
 0x10f   : > { %v638_v42 = vpop.f32.mrf.mxu0  ;;  %v709_v43 = vpop.f32.mrf.mxu1 }
 0x111   : > { %v640_v44 = vpop.f32.mrf.mxu0  ;;  %v711_v45 = vpop.f32.mrf.mxu1 }
 0x113   : > { %v2804_v46 = vpop.f32.mrf.mxu0  ;;  %v2806_v47 = vpop.f32.mrf.mxu1 }
 0x115   : > { %v2808_v48 = vpop.f32.mrf.mxu0  ;;  %v2810_v49 = vpop.f32.mrf.mxu1 }
 0x117   : > { %v2812_v50 = vpop.f32.mrf.mxu0  ;;  %v2814_v51 = vpop.f32.mrf.mxu1 }
 0x119   : > { %v2816_v52 = vpop.f32.mrf.mxu0  ;;  %v2818_v53 = vpop.f32.mrf.mxu1 }
 0x11b   : > { %v1115_v55 = vpop.f32.mrf.mxu0  ;;  %v1186_v56 = vpop.f32.mrf.mxu1 }
 0x11c   : > { %v1116_v57 = vadd.f32 %v1115_v55, %v496_v38  ;;  %v1187_v58 = vadd.f32 %v1186_v56, %v567_v39 }
 0x11d   : > { %v1117_v59 = vpop.f32.mrf.mxu0  ;;  %v1188_v60 = vpop.f32.mrf.mxu1 }
 0x11e   : > { %v1118_v61 = vadd.f32 %v1117_v59, %v498_v40  ;;  %v1189_v62 = vadd.f32 %v1188_v60, %v569_v41  ;;  %v1623_v63 = vadd.f32 %v2820_v54, %v1116_v57  ;;  %v1625_v0 = vadd.f32 %v2820_v54, %v1187_v58 }
 0x11f   : > { %v1257_v1 = vpop.f32.mrf.mxu0  ;;  %v1328_v4 = vpop.f32.mrf.mxu1 }
 0x120   : > { %v1624_v5 = vadd.f32 %v2820_v54, %v1118_v61  ;;  %v1626_v8 = vadd.f32 %v2820_v54, %v1189_v62  ;;  %v1258_v9 = vadd.f32 %v1257_v1, %v638_v42  ;;  %v1329_v10 = vadd.f32 %v1328_v4, %v709_v43 }
 0x121   : > { %v1639_v14 = vmax.f32 %v1623_v63, 0.0  ;;  %v1641_v17 = vmax.f32 %v1625_v0, 0.0  ;;  %v1259_v18 = vpop.f32.mrf.mxu0  ;;  %v1330_v20 = vpop.f32.mrf.mxu1 }
 0x122   : > { %v1640_v21 = vmax.f32 %v1624_v5, 0.0  ;;  %v1642_v22 = vmax.f32 %v1626_v8, 0.0  ;;  %v1627_v23 = vadd.f32 %v2820_v54, %v1258_v9  ;;  %v1629_v24 = vadd.f32 %v2820_v54, %v1329_v10 }
 0x123   : > { %v1661_v25 = vmul.f32 %v2826_v13, %v1639_v14  ;;  %v1663_v26 = vmul.f32 %v2826_v13, %v1641_v17  ;;  %v1260_v27 = vadd.f32 %v1259_v18, %v640_v44  ;;  %v1331_v28 = vadd.f32 %v1330_v20, %v711_v45  ;;  %v1399_v29 = vpop.f32.mrf.mxu0  ;;  %v1470_v30 = vpop.f32.mrf.mxu1 }
 0x124   : > { %v1643_v31 = vmax.f32 %v1627_v23, 0.0  ;;  %v1645_v32 = vmax.f32 %v1629_v24, 0.0  ;;  %v1662_v33 = vmul.f32 %v2826_v13, %v1640_v21  ;;  %v1664_v34 = vmul.f32 %v2826_v13, %v1642_v22 }
 0x125   : > { %v1677_v35 = vrot.slane %v1661_v25, 4  ;;  %v1689_v36 = vrot.slane %v1663_v26, 4  ;;  %v1628_v37 = vadd.f32 %v2820_v54, %v1260_v27  ;;  %v1630_v38 = vadd.f32 %v2820_v54, %v1331_v28  ;;  %v1401_v56 = vpop.f32.mrf.mxu0  ;;  %v1472_v57 = vpop.f32.mrf.mxu1 }
 0x126   : > { %v1683_v39 = vrot.slane %v1662_v33, 4  ;;  %v1695_v40 = vrot.slane %v1664_v34, 4  ;;  %v1665_v41 = vmul.f32 %v2826_v13, %v1643_v31  ;;  %v1667_v42 = vmul.f32 %v2826_v13, %v1645_v32 }
 0x127   : > { %v2840_v43 = vadd.f32 %v1677_v35, %v1661_v25  ;;  %v2842_v44 = vadd.f32 %v1689_v36, %v1663_v26  ;;  %v1644_v45 = vmax.f32 %v1628_v37, 0.0  ;;  %v1646_v55 = vmax.f32 %v1630_v38, 0.0 }
 0x128   : > { %v2844_v58 = vadd.f32 %v1683_v39, %v1662_v33  ;;  %v2846_v59 = vadd.f32 %v1695_v40, %v1664_v34  ;;  %v1701_v60 = vrot.slane %v1665_v41, 4  ;;  %v1713_v61 = vrot.slane %v1667_v42, 4 }
 0x129   : > { %v1666_v62 = vmul.f32 %v2826_v13, %v1644_v45  ;;  %v1668_v63 = vmul.f32 %v2826_v13, %v1646_v55  ;;  %v1400_v0 = vadd.f32 %v1399_v29, %v2804_v46  ;;  %v1471_v1 = vadd.f32 %v1470_v30, %v2806_v47 }
 0x12a   : > { %v1702_v4 = vadd.f32 %v1701_v60, %v1665_v41  ;;  %v1714_v5 = vadd.f32 %v1713_v61, %v1667_v42  ;;  %v1402_v8 = vadd.f32 %v1401_v56, %v2808_v48  ;;  %v1473_v9 = vadd.f32 %v1472_v57, %v2810_v49 }
 0x12b   : > { %v1707_v10 = vrot.slane %v1666_v62, 4  ;;  %v1719_v14 = vrot.slane %v1668_v63, 4  ;;  %v1631_v17 = vadd.f32 %v2820_v54, %v1400_v0  ;;  %v1633_v18 = vadd.f32 %v2820_v54, %v1471_v1  ;;  %v1541_v1 = vpop.f32.mrf.mxu0 }
 0x12c   : > { %v1703_v20 = vrot.slane %v1702_v4, 2  ;;  %v1715_v21 = vrot.slane %v1714_v5, 2  ;;  %v1632_v22 = vadd.f32 %v2820_v54, %v1402_v8  ;;  %v1634_v46 = vadd.f32 %v2820_v54, %v1473_v9 }
 0x12d   : > { %v1708_v23 = vadd.f32 %v1707_v10, %v1666_v62  ;;  %v1720_v47 = vadd.f32 %v1719_v14, %v1668_v63  ;;  %v1647_v24 = vmax.f32 %v1631_v17, 0.0  ;;  %v1649_v25 = vmax.f32 %v1633_v18, 0.0 }
 0x12e   : > { %v1704_v26 = vadd.f32 %v1703_v20, %v1702_v4  ;;  %v1716_v48 = vadd.f32 %v1715_v21, %v1714_v5  ;;  %v1648_v27 = vmax.f32 %v1632_v22, 0.0  ;;  %v1650_v49 = vmax.f32 %v1634_v46, 0.0 }
 0x12f   : > { %v1709_v28 = vrot.slane %v1708_v23, 2  ;;  %v1721_v29 = vrot.slane %v1720_v47, 2  ;;  %v1669_v30 = vmul.f32 %v2826_v13, %v1647_v24  ;;  %v1671_v31 = vmul.f32 %v2826_v13, %v1649_v25 }
 0x130   : > { %v1705_v32 = vrot.slane %v1704_v26, 1  ;;  %v1717_v33 = vrot.slane %v1716_v48, 1  ;;  %v1670_v34 = vmul.f32 %v2826_v13, %v1648_v27  ;;  %v1672_v35 = vmul.f32 %v2826_v13, %v1650_v49 }
 0x131   : > { %v1710_v36 = vadd.f32 %v1709_v28, %v1708_v23  ;;  %v1722_v37 = vadd.f32 %v1721_v29, %v1720_v47  ;;  %v1725_v38 = vrot.slane %v1669_v30, 4  ;;  %v1737_v39 = vrot.slane %v1671_v31, 4  ;;  %v1612_v23 = vpop.f32.mrf.mxu1 }
 0x132   : > { %v1706_v40 = vadd.f32 %v1705_v32, %v1704_v26  ;;  %v1718_v41 = vadd.f32 %v1717_v33, %v1716_v48  ;;  %v1731_v42 = vrot.slane %v1670_v34, 4  ;;  %v1743_v45 = vrot.slane %v1672_v35, 4  ;;  %v1543_v26 = vpop.f32.mrf.mxu0 }
 0x133   : > { %v1711_v55 = vrot.slane %v1710_v36, 1  ;;  %v1723_v56 = vrot.slane %v1722_v37, 1  ;;  %v1726_v57 = vadd.f32 %v1725_v38, %v1669_v30  ;;  %v1738_v60 = vadd.f32 %v1737_v39, %v1671_v31 }
 0x134   : > { %v1779_v61 = vadd.f32 %v2828_v19, %v1706_v40  ;;  %v1781_v62 = vadd.f32 %v2828_v19, %v1718_v41  ;;  %v1732_v63 = vadd.f32 %v1731_v42, %v1670_v34  ;;  %v1744_v0 = vadd.f32 %v1743_v45, %v1672_v35  ;;  %v1614_v35 = vpop.f32.mrf.mxu1 }
 0x135   : > { %v1712_v4 = vadd.f32 %v1711_v55, %v1710_v36  ;;  %v1724_v5 = vadd.f32 %v1723_v56, %v1722_v37  ;;  %v1727_v8 = vrot.slane %v1726_v57, 2  ;;  %v1739_v9 = vrot.slane %v1738_v60, 2 }
 0x136   : > { %v2133_v10 = vmul.f32 -1.442695, %v1779_v61  ;;  %v2135_v14 = vmul.f32 -1.442695, %v1781_v62  ;;  %v1733_v17 = vrot.slane %v1732_v63, 2  ;;  %v1745_v18 = vrot.slane %v1744_v0, 2 }
 0x137   : > { %v1780_v20 = vadd.f32 %v2828_v19, %v1712_v4  ;;  %v1782_v21 = vadd.f32 %v2828_v19, %v1724_v5  ;;  %v1728_v22 = vadd.f32 %v1727_v8, %v1726_v57  ;;  %v1740_v46 = vadd.f32 %v1739_v9, %v1738_v60 }
 0x138   : > { %2253 = vpow2.f32 %v2133_v10  ;;  %v1734_v47 = vadd.f32 %v1733_v17, %v1732_v63  ;;  %v1746_v24 = vadd.f32 %v1745_v18, %v1744_v0  ;;  %v1542_v25 = vadd.f32 %v1541_v1, %v2812_v50 }
 0x139   : > { %v2134_v48 = vmul.f32 -1.442695, %v1780_v20  ;;  %2255 = vpow2.f32 %v2135_v14  ;;  %v2136_v27 = vmul.f32 -1.442695, %v1782_v21  ;;  %v1729_v49 = vrot.slane %v1728_v22, 1 }
 0x13a   : > { %v1741_v28 = vrot.slane %v1740_v46, 1  ;;  %v1735_v29 = vrot.slane %v1734_v47, 1  ;;  %v1747_v30 = vrot.slane %v1746_v24, 1  ;;  %v1635_v31 = vadd.f32 %v2820_v54, %v1542_v25 }
 0x13b   : > { %2257 = vpow2.f32 %v2134_v48  ;;  %v1730_v32 = vadd.f32 %v1729_v49, %v1728_v22  ;;  %v1613_v33 = vadd.f32 %v1612_v23, %v2814_v51  ;;  %v1544_v34 = vadd.f32 %v1543_v26, %v2816_v52 }
 0x13c   : > { %2259 = vpow2.f32 %v2136_v27  ;;  %v1742_v36 = vadd.f32 %v1741_v28, %v1740_v46  ;;  %v1736_v50 = vadd.f32 %v1735_v29, %v1734_v47  ;;  %v1748_v37 = vadd.f32 %v1747_v30, %v1746_v24 }
 0x13d   : > { %v1783_v38 = vadd.f32 %v2828_v19, %v1730_v32  ;;  %v1651_v39 = vmax.f32 %v1635_v31, 0.0  ;;  %v1637_v40 = vadd.f32 %v2820_v54, %v1613_v33  ;;  %v1636_v41 = vadd.f32 %v2820_v54, %v1544_v34 }
 0x13e   : > { %v1785_v42 = vadd.f32 %v2828_v19, %v1742_v36  ;;  %v1784_v45 = vadd.f32 %v2828_v19, %v1736_v50  ;;  %v1786_v51 = vadd.f32 %v2828_v19, %v1748_v37  ;;  %v1615_v52 = vadd.f32 %v1614_v35, %v2818_v53 }
 0x13f   : > { %v2137_v55 = vmul.f32 -1.442695, %v1783_v38  ;;  %v1673_v56 = vmul.f32 %v2826_v13, %v1651_v39  ;;  %v1653_v57 = vmax.f32 %v1637_v40, 0.0  ;;  %v1652_v60 = vmax.f32 %v1636_v41, 0.0 }
 0x140   : > { %v2139_v61 = vmul.f32 -1.442695, %v1785_v42  ;;  %v2138_v62 = vmul.f32 -1.442695, %v1784_v45  ;;  %v2140_v63 = vmul.f32 -1.442695, %v1786_v51  ;;  %v1638_v0 = vadd.f32 %v2820_v54, %v1615_v52 }
 0x141   : > { %2261 = vpow2.f32 %v2137_v55  ;;  %v1749_v1 = vrot.slane %v1673_v56, 4  ;;  %v1675_v4 = vmul.f32 %v2826_v13, %v1653_v57  ;;  %v1674_v5 = vmul.f32 %v2826_v13, %v1652_v60 }
 0x142   : > { %2263 = vpow2.f32 %v2139_v61  ;;  %v1654_v8 = vmax.f32 %v1638_v0, 0.0  ;;  %v1679_v53 = vrot.slane %v2840_v43, 2  ;;  %v1685_v9 = vrot.slane %v2844_v58, 2 }
 0x143   : > { %2265 = vpow2.f32 %v2138_v62  ;;  %v1750_v10 = vadd.f32 %v1749_v1, %v1673_v56  ;;  %v1761_v14 = vrot.slane %v1675_v4, 4  ;;  %v1755_v17 = vrot.slane %v1674_v5, 4 }
 0x144   : > { %2267 = vpow2.f32 %v2140_v63  ;;  %v1676_v18 = vmul.f32 %v2826_v13, %v1654_v8  ;;  %v1680_v54 = vadd.f32 %v1679_v53, %v2840_v43  ;;  %v1686_v20 = vadd.f32 %v1685_v9, %v2844_v58 }
 0x145   : > { %v2254_v21 = vpop.eup %2253  ;;  %v1751_v22 = vrot.slane %v1750_v10, 2  ;;  %v1762_v46 = vadd.f32 %v1761_v14, %v1675_v4  ;;  %v1756_v23 = vadd.f32 %v1755_v17, %v1674_v5  ;;  %v1691_v47 = vrot.slane %v2842_v44, 2 }
 0x146   : > { %v2256_v24 = vpop.eup %2255  ;;  %v1843_v25 = vadd.f32 1.0, %v2254_v21  ;;  %v1767_v26 = vrot.slane %v1676_v18, 4  ;;  %v1681_v48 = vrot.slane %v1680_v54, 1  ;;  %v1687_v27 = vrot.slane %v1686_v20, 1 }
 0x147   : > { %v1845_v49 = vadd.f32 1.0, %v2256_v24  ;;  %v1752_v28 = vadd.f32 %v1751_v22, %v1750_v10  ;;  %v1763_v29 = vrot.slane %v1762_v46, 2  ;;  %v1757_v30 = vrot.slane %v1756_v23, 2 }
 0x148   : > { %v2258_v13 = vpop.eup %2257  ;;  %2269 = vrcp.f32 %v1843_v25  ;;  %v1768_v43 = vadd.f32 %v1767_v26, %v1676_v18  ;;  %v1682_v31 = vadd.f32 %v1681_v48, %v1680_v54  ;;  %v1688_v58 = vadd.f32 %v1687_v27, %v1686_v20 }
 0x149   : > { %v2260_v32 = vpop.eup %2259  ;;  %v1844_v33 = vadd.f32 1.0, %v2258_v13  ;;  %2271 = vrcp.f32 %v1845_v49  ;;  %v1753_v34 = vrot.slane %v1752_v28, 1  ;;  %v1764_v35 = vadd.f32 %v1763_v29, %v1762_v46 }
 0x14a   : > { %v1846_v36 = vadd.f32 1.0, %v2260_v32  ;;  %v1758_v50 = vadd.f32 %v1757_v30, %v1756_v23  ;;  %v1769_v37 = vrot.slane %v1768_v43, 2  ;;  %v1692_v38 = vadd.f32 %v1691_v47, %v2842_v44 }
 0x14b   : > { %2273 = vrcp.f32 %v1844_v33  ;;  %v1754_v39 = vadd.f32 %v1753_v34, %v1752_v28  ;;  %v1765_v40 = vrot.slane %v1764_v35, 1  ;;  %v1697_v41 = vrot.slane %v2846_v59, 2 }
 0x14c   : > { %2275 = vrcp.f32 %v1846_v36  ;;  %v1759_v42 = vrot.slane %v1758_v50, 1  ;;  %v1770_v45 = vadd.f32 %v1769_v37, %v1768_v43  ;;  %v1693_v51 = vrot.slane %v1692_v38, 1 }
 0x14d   : > { %v1787_v52 = vadd.f32 %v2828_v19, %v1754_v39  ;;  %v1766_v55 = vadd.f32 %v1765_v40, %v1764_v35  ;;  %v1698_v56 = vadd.f32 %v1697_v41, %v2846_v59  ;;  %v1775_v62 = vadd.f32 %v2828_v19, %v1682_v31 }
 0x14e   : > { %v2262_v57 = vpop.eup %2261  ;;  %v1760_v60 = vadd.f32 %v1759_v42, %v1758_v50  ;;  %v1771_v61 = vrot.slane %v1770_v45, 1  ;;  %v1694_v1 = vadd.f32 %v1693_v51, %v1692_v38  ;;  %v1776_v10 = vadd.f32 %v2828_v19, %v1688_v58 }
 0x14f   : > { %v2264_v44 = vpop.eup %2263  ;;  %v1847_v63 = vadd.f32 1.0, %v2262_v57  ;;  %v1789_v0 = vadd.f32 %v2828_v19, %v1766_v55  ;;  %v1699_v4 = vrot.slane %v1698_v56, 1  ;;  %v2141_v17 = vmul.f32 -1.442695, %v1787_v52 }
 0x150   : > { %v2266_v5 = vpop.eup %2265  ;;  %v1849_v8 = vadd.f32 1.0, %v2264_v44  ;;  %v1788_v53 = vadd.f32 %v2828_v19, %v1760_v60  ;;  %v1772_v9 = vadd.f32 %v1771_v61, %v1770_v45  ;;  %v1777_v46 = vadd.f32 %v2828_v19, %v1694_v1 }
 0x151   : > { %v2268_v14 = vpop.eup %2267  ;;  %2277 = vrcp.f32 %v1847_v63  ;;  %v1848_v59 = vadd.f32 1.0, %v2266_v5  ;;  %v1700_v18 = vadd.f32 %v1699_v4, %v1698_v56  ;;  %v2143_v20 = vmul.f32 -1.442695, %v1789_v0 }
 0x152   : > { %2279 = vrcp.f32 %v1849_v8  ;;  %v1850_v54 = vadd.f32 1.0, %v2268_v14  ;;  %v1790_v21 = vadd.f32 %v2828_v19, %v1772_v9  ;;  %v2142_v22 = vmul.f32 -1.442695, %v1788_v53 }
 0x153   : > { %2281 = vrcp.f32 %v1848_v59  ;;  %v1778_v47 = vadd.f32 %v2828_v19, %v1700_v18  ;;  %v2129_v25 = vmul.f32 -1.442695, %v1775_v62  ;;  %v2130_v48 = vmul.f32 -1.442695, %v1776_v10 }
 0x154   : > { %2283 = vrcp.f32 %v1850_v54  ;;  %v2144_v23 = vmul.f32 -1.442695, %v1790_v21  ;;  %v2131_v27 = vmul.f32 -1.442695, %v1777_v46 }
 0x155   : > { %v2270_v24 = vpop.eup %2269  ;;  %2285 = vpow2.f32 %v2141_v17  ;;  %v2132_v28 = vmul.f32 -1.442695, %v1778_v47 }
 0x156   : > { %v2272_v26 = vpop.eup %2271  ;;  %2287 = vpow2.f32 %v2143_v20 }
 0x157   : > { %2289 = vpow2.f32 %v2142_v22 }
 0x158   : > { %v2274_v49 = vpop.eup %2273  ;;  %2291 = vpow2.f32 %v2144_v23 }
 0x159   : > { %v2276_v29 = vpop.eup %2275  ;;  %v1905_v30 = vcombine.low %v2270_v24, %v2274_v49  ;;  %2293 = vpow2.f32 %v2129_v25 }
 0x15a   : > { %v1906_v13 = vcombine.low %v2272_v26, %v2276_v29  ;;  %2295 = vpow2.f32 %v2130_v48 }
 0x15b   : > { %v1921_v43 = vmul.f32 %v1905_v30, %v2685_v6  ;;  %2297 = vpow2.f32 %v2131_v27 }
 0x15c   : > { %v1922_v19 = vmul.f32 %v1906_v13, %v2688_v7  ;;  %2299 = vpow2.f32 %v2132_v28 }
 0x15d   : > { %1929 = vst [vmem:[%s2901_s14 + $0x10] sm:$0xff] %v1921_v43 }
 0x15e   : > { %v2278_v31 = vpop.eup %2277  ;;  %1930 = vst [vmem:[%s2901_s14 + $0x18] sm:$0xff] %v1922_v19 }
 0x15f   : > { %v2280_v58 = vpop.eup %2279 }
 0x160   : > { %v2282_v32 = vpop.eup %2281 }
 0x161   : > { %v2284_v33 = vpop.eup %2283  ;;  %v1907_v34 = vcombine.low %v2278_v31, %v2282_v32 }
 0x162   : > { %v2286_v35 = vpop.eup %2285  ;;  %v1908_v36 = vcombine.low %v2280_v58, %v2284_v33 }
 0x163   : > { %v2288_v6 = vpop.eup %2287  ;;  %v1923_v50 = vmul.f32 %v1907_v34, %v2700_v11  ;;  %v1851_v7 = vadd.f32 1.0, %v2286_v35 }
 0x164   : > { %v2290_v37 = vpop.eup %2289  ;;  %v1924_v38 = vmul.f32 %v1908_v36, %v2703_v12  ;;  %v1853_v39 = vadd.f32 1.0, %v2288_v6 }
 0x165   : > { %v2292_v40 = vpop.eup %2291  ;;  %2301 = vrcp.f32 %v1851_v7  ;;  %v1852_v41 = vadd.f32 1.0, %v2290_v37  ;;  %1931 = vst [vmem:[%s2901_s14 + $0x20] sm:$0xff] %v1923_v50 }
 0x166   : > { %v2294_v42 = vpop.eup %2293  ;;  %2303 = vrcp.f32 %v1853_v39  ;;  %v1854_v45 = vadd.f32 1.0, %v2292_v40  ;;  %1932 = vst [vmem:[%s2901_s14 + $0x28] sm:$0xff] %v1924_v38 }
 0x167   : > { %v2296_v51 = vpop.eup %2295  ;;  %2305 = vrcp.f32 %v1852_v41  ;;  %v1839_v52 = vadd.f32 1.0, %v2294_v42 }
 0x168   : > { %v2298_v55 = vpop.eup %2297  ;;  %2307 = vrcp.f32 %v1854_v45  ;;  %v1840_v11 = vadd.f32 1.0, %v2296_v51 }
 0x169   : > { %v2300_v56 = vpop.eup %2299  ;;  %v1841_v57 = vadd.f32 1.0, %v2298_v55  ;;  %2309 = vrcp.f32 %v1839_v52 }
 0x16a   : > { %v1842_v12 = vadd.f32 1.0, %v2300_v56  ;;  %2311 = vrcp.f32 %v1840_v11 }
 0x16b   : > { %2313 = vrcp.f32 %v1841_v57 }
 0x16c   : > { %2315 = vrcp.f32 %v1842_v12 }
 0x172   : > { %v2302_v60 = vpop.eup %2301 }
 0x173   : > { %v2304_v61 = vpop.eup %2303 }
 0x174   : > { %v2306_v62 = vpop.eup %2305 }
 0x175   : > { %v2308_v44 = vpop.eup %2307  ;;  %v1909_v63 = vcombine.low %v2302_v60, %v2306_v62 }
 0x176   : > { %v2310_v0 = vpop.eup %2309  ;;  %v1910_v1 = vcombine.low %v2304_v61, %v2308_v44 }
 0x177   : > { %v2312_v4 = vpop.eup %2311  ;;  %v1925_v5 = vmul.f32 %v1909_v63, %v2722_v15 }
 0x178   : > { %v2314_v8 = vpop.eup %2313  ;;  %v1926_v53 = vmul.f32 %v1910_v1, %v2725_v16  ;;  %v1903_v9 = vcombine.low %v2310_v0, %v2312_v4 }
 0x179   : > { %v2316_v10 = vpop.eup %2315  ;;  %1933 = vst [vmem:[%s2901_s14 + $0x30] sm:$0xff] %v1925_v5 }
 0x17a   : > { %v1904_v14 = vcombine.low %v2314_v8, %v2316_v10  ;;  %v1919_v59 = vmul.f32 %v1903_v9, %v2675_v2  ;;  %1934 = vst [vmem:[%s2901_s14 + $0x38] sm:$0xff] %v1926_v53 }
 0x17c   : > { %v1920_v17 = vmul.f32 %v1904_v14, %v2678_v3  ;;  %1927 = vst [vmem:[%s2901_s14] sm:$0xff] %v1919_v59 }
 0x17e   : > { %1928 = vst [vmem:[%s2901_s14 + $0x8] sm:$0xff] %v1920_v17 }
 0x17f   : > { %2386 = shalt.err (!%p2383_p3)
}
 0x180   : > { %s2387_s10 = scalar_lea.hbm %s1950_s17, 1024  ;;  %s2391_s15 = scalar_lea.hbm %s2971_s7, 4096 }
 0x181   : > { %p2388_p7 = scmp.ne.s32.totalorder %s1950_s17, %s2387_s10  ;;  %p2392_p10 = scmp.lt.s32.totalorder %s1950_s17, %s2971_s7 }
 0x182   : > { %p2393_p11 = scmp.lt.s32.totalorder %s2391_s15, %s2387_s10 }
 0x183   : > { %p2389_p1 = pnand %p2388_p7, %p2588_p9 }
 0x184   : > { %p2394_p8 = por %p2393_p11, %p2392_p10 }
 0x185   : > { %p2390_p2 = pneg %p2389_p1 }
 0x187   : > { %p2395_p0 = pnand %p2394_p8, %p2390_p2 }
 0x189   : > { %2398 = shalt.err (!%p2395_p0)
}
 0x18a   : > { %2155 = dma.vmem_to_hbm [thread:$0]  (%p2588_p9), %s1953_s30, 1024, %s1950_s17, %s1936_s21  }
 0x18b PF: > { %p2169_p4 = scmp.ge.s32.totalorder %s2473_s6, 2  ;;  %s1964_s0 = sand.u32 1, %s2445_s26  }
 0x18c   : > { %s1965_s29 = scalar_lea.sflag [#allocation5], %s1964_s0 }
 0x18d   : > { %p2165_p13 = pnand %p2169_p4, %p2594_p12 }
 0x18f   : > { %p2166_p5 = pneg %p2165_p13 }
 0x191   : > { %2440 = dma.done.wait (%p2166_p5), %s1965_s29, 1024  }
 0x192   : > { %2442 = vsyncadd (%p2166_p5), %s1965_s29, 4294966272  ;;  %s27_s6 = sadd.s32 1, %s2473_s6   ;;  %s2989_s30 = sld [smem:[#allocation12_spill]] }
 0x193   : > { %p24_p6 = scmp.ge.s32.totalorder %s27_s6, 6   ;;  %s2990_s18 = sld [smem:[#allocation13_spill]] }
 0x194   : > { %s2991_s9 = sld [smem:[#allocation14_spill]]  ;;  %s2992_s26 = smov %s2449_s27 }
 0x195   : > { %s2993_s27 = smov %s2453_s28  ;;  %s2994_s28 = smov %s2603_s23 }
 0x196   : > { %s2995_s29 = smov %s2465_s8  ;;  %26 = sbr.rel (!%p24_p6) target bundleno = 12 (0xc), region = 106 }
 0x199   : > { %s2996_s8 = smov %s2990_s18 }
 0x19b   :  { %1970 = vsyncpa [#allocation4], 1 }
 0x19c   :  { %1972 = vsyncpa [#allocation4 + $0x1], 1 }
 0x19d   :  { %1973 = vsyncpa [#allocation7], 1 }
 0x19e   :  { %1975 = vsyncpa [#allocation7 + $0x1], 1 }
 0x19f   :  { %1976 = vsyncpa [#allocation5], 1 }
 0x1a0   :  { %1978 = vsyncpa [#allocation5 + $0x1], 1 }

</bundles_post_ra>
